<compile_context>
chip_gen: v5e
topology: v5e:2x2
jax: 0.10.0
libtpu: 0.0.40
codegen_flags: <defaults>
</compile_context>

<pallas_src>
import functools

import jax
import jax.numpy as jnp
from jax.experimental import pallas as pl
from jax.experimental.pallas import tpu as pltpu


def _se_kernel(x_ref, w1t_ref, b1_ref, w2t_ref, b2_ref, o_ref, *, inv_hw):
    # ---- Squeeze: global average pool over the spatial (lane) axis. -------
    # Direct read of x_ref (no long-lived full-block binding); accumulate the
    # lane reduction in f32 and scale by 1 / (true HW).
    mean = jnp.sum(x_ref[...], axis=-1, dtype=jnp.float32) * inv_hw    # (TN, C)

    # ---- Excite: 1x1 conv -> ReLU -> 1x1 conv -> sigmoid. -----------------
    # Compute dtype of the matmuls follows the (wrapper-chosen) weight dtype;
    # accumulation stays f32.
    h = jnp.dot(mean.astype(w1t_ref.dtype), w1t_ref[...],
                preferred_element_type=jnp.float32) + b1_ref[...]      # (TN, RC)
    h = jnp.maximum(h, 0.0)                                             # ReLU
    s = jnp.dot(h.astype(w2t_ref.dtype), w2t_ref[...],
                preferred_element_type=jnp.float32) + b2_ref[...]      # (TN, C)
    s = jax.nn.sigmoid(s)                                               # (TN, C)

    # ---- Scale: re-read x_ref (VMEM loads are cheap: 3 vld slots/cycle) and
    # gate per channel in the native dtype (no f32 upcast of the big slab).
    o_ref[...] = x_ref[...] * s[:, :, None].astype(o_ref.dtype)


def _vmem_limit_bytes():
    """Generation-aware scoped-VMEM limit: <=75% of physical, capped at 96 MiB.

    v5e/v6e (128 MiB physical) -> 96 MiB; v7x (64 MiB per TC) -> 48 MiB.
    Falls back to the conservative 48 MiB if the hardware query is unavailable.
    """
    try:
        cap = int(pltpu.get_tpu_info().vmem_capacity_bytes)
    except Exception:
        cap = 64 * 1024 * 1024
    return int(min(cap * 3 // 4, 96 * 1024 * 1024))


def _pick_batch_tile(n, c, hw, itemsize, vmem_limit):
    """Batch rows per block.

    Live VMEM ~= 2*(x block) + 2*(out block) + tiny weights (BlockSpec
    double-buffering), so keep per-block bytes <= vmem_limit // 8 (~50% total
    utilization -> 12 MiB blocks on v5e/v6e, 6 MiB on v7x).  Cap TN so the
    grid has >= 4 steps: v7x shards the parallel axis across 2 TensorCores
    and each core needs >= 2 steps for the pipeline to overlap.
    """
    block_budget = max(1, vmem_limit // 8)
    per_row = max(1, c * hw * itemsize)
    tn = max(1, block_budget // per_row)
    tn = min(tn, n)
    tn = min(tn, max(1, n // 4))
    return tn


@jax.jit
def squeeze_excite(x_nchw, w1, b1, w2, b2):
    """x_nchw: (N, C, H, W).  w1: (RC, C), b1: (RC,), w2: (C, RC), b2: (C,).

    PointwiseConv2d(in, out) == 1x1 Conv2d with bias: weight (out, in).
    """
    N, C, H, W = x_nchw.shape
    HW = H * W
    RC = w1.shape[0]

    x = x_nchw.reshape(N, C, HW)          # contiguous reshape: free view, no HBM pass

    # Excite compute dtype: exact f32 for f32 activations; bf16 (MXU-native on
    # v6e/v7x) for sub-32-bit activations.  Biases stay f32 (added post-MXU).
    excite_dtype = jnp.float32 if x.dtype == jnp.float32 else jnp.bfloat16
    w1t = w1.T.astype(excite_dtype)                     # (C, RC)
    w2t = w2.T.astype(excite_dtype)                     # (RC, C)
    b1r = b1.reshape(1, RC).astype(jnp.float32)
    b2r = b2.reshape(1, C).astype(jnp.float32)

    vmem_limit = _vmem_limit_bytes()
    tn = _pick_batch_tile(N, C, HW, x.dtype.itemsize, vmem_limit)
    grid = (pl.cdiv(N, tn),)              # partial tail block OK: rows are
                                          # independent, OOB writeback masked.

    # NOTE: input_output_aliases={0: 0} was considered to halve the HBM
    # footprint, but x here aliases the caller's (non-donated) input buffer,
    # so XLA would insert a defensive copy -- a net extra HBM pass.  Skipped.
    out = pl.pallas_call(
        functools.partial(_se_kernel, inv_hw=float(1.0 / HW)),
        out_shape=jax.ShapeDtypeStruct((N, C, HW), x.dtype),
        grid_spec=pltpu.PrefetchScalarGridSpec(
            num_scalar_prefetch=0,
            grid=grid,
            in_specs=[
                # Last two block dims are the FULL array extents (C, HW), so
                # no (8,128) padding and no wrapper-side jnp.pad is required.
                pl.BlockSpec((tn, C, HW), lambda n: (n, 0, 0)),   # x
                pl.BlockSpec((C, RC), lambda n: (0, 0)),          # w1^T
                pl.BlockSpec((1, RC), lambda n: (0, 0)),          # b1
                pl.BlockSpec((RC, C), lambda n: (0, 0)),          # w2^T
                pl.BlockSpec((1, C), lambda n: (0, 0)),           # b2
            ],
            out_specs=pl.BlockSpec((tn, C, HW), lambda n: (n, 0, 0)),
        ),
        compiler_params=pltpu.CompilerParams(
            dimension_semantics=("parallel",),
            vmem_limit_bytes=vmem_limit,
        ),
    )(x, w1t, b1r, w2t, b2r)

    return out.reshape(N, C, H, W)


def _reference(x, w1, b1, w2, b2):
    # Pure-JAX reference mirroring the PyTorch module (f32).
    mean = jnp.mean(x, axis=(2, 3), keepdims=True)               # (N, C, 1, 1)
    h = jnp.einsum("rc,ncij->nrij", w1, mean) + b1[None, :, None, None]
    h = jnp.maximum(h, 0.0)
    s = jnp.einsum("cr,nrij->ncij", w2, h) + b2[None, :, None, None]
    s = jax.nn.sigmoid(s)
    return x * s


if __name__ == "__main__":
    key = jax.random.PRNGKey(0)
    N, C, H, W = 2, 8, 16, 16
    reduction = 4
    RC = int(max(1, round(C / reduction)))                       # 2

    k_x, k_w1, k_b1, k_w2, k_b2 = jax.random.split(key, 5)
    x = jax.random.normal(k_x, (N, C, H, W), dtype=jnp.float32)

    # PointwiseConv2d(in, out) == 1x1 Conv2d with bias: weight (out, in), bias (out,)
    w1 = jax.random.normal(k_w1, (RC, C), dtype=jnp.float32) * 0.5
    b1 = jax.random.normal(k_b1, (RC,), dtype=jnp.float32) * 0.1
    w2 = jax.random.normal(k_w2, (C, RC), dtype=jnp.float32) * 0.5
    b2 = jax.random.normal(k_b2, (C,), dtype=jnp.float32) * 0.1

    # 1) Basic f32, HW a multiple of 128.
    out = jax.block_until_ready(squeeze_excite(x, w1, b1, w2, b2))
    ref = _reference(x, w1, b1, w2, b2)
    assert out.shape == x.shape and out.dtype == x.dtype
    assert jnp.allclose(out, ref, atol=1e-5, rtol=1e-5)

    # 2) Non-128-multiple spatial size (HW = 49), no wrapper padding needed.
    x2 = jax.random.normal(jax.random.PRNGKey(1), (3, C, 7, 7), dtype=jnp.float32)
    out2 = jax.block_until_ready(squeeze_excite(x2, w1, b1, w2, b2))
    ref2 = _reference(x2, w1, b1, w2, b2)
    assert out2.shape == x2.shape
    assert jnp.allclose(out2, ref2, atol=1e-5, rtol=1e-5)

    # 3) Batch that doesn't divide the tile (N=9, TN=2): exercises the
    #    pl.cdiv partial tail block.
    x3 = jax.random.normal(jax.random.PRNGKey(2), (9, C, 5, 5), dtype=jnp.float32)
    out3 = jax.block_until_ready(squeeze_excite(x3, w1, b1, w2, b2))
    ref3 = _reference(x3, w1, b1, w2, b2)
    assert out3.shape == x3.shape
    assert jnp.allclose(out3, ref3, atol=1e-5, rtol=1e-5)

    # 4) bf16 activations: exercises the bf16 excite-matmul path (looser tol
    #    because the slab, gate, and output are all rounded to bf16).
    xb = x.astype(jnp.bfloat16)
    outb = jax.block_until_ready(squeeze_excite(xb, w1, b1, w2, b2))
    refb = _reference(xb.astype(jnp.float32), w1, b1, w2, b2)
    assert outb.shape == xb.shape and outb.dtype == jnp.bfloat16
    assert jnp.allclose(outb.astype(jnp.float32), refb, atol=5e-2, rtol=5e-2)

    print("KERNEL_OK")
</pallas_src>

<mosaic_0001>
module attributes {stable_mosaic.version = 11 : i64} {
  func.func @_se_kernel(%arg0: i32, %arg1: memref<1x8x256xf32, #tpu.memory_space<vmem>>, %arg2: memref<8x2xf32, #tpu.memory_space<vmem>>, %arg3: memref<1x2xf32, #tpu.memory_space<vmem>>, %arg4: memref<2x8xf32, #tpu.memory_space<vmem>>, %arg5: memref<1x8xf32, #tpu.memory_space<vmem>>, %arg6: memref<1x8x256xf32, #tpu.memory_space<vmem>>) attributes {dimension_semantics = [#tpu.dimension_semantics<parallel>], iteration_bounds = array<i64: 2>, scalar_prefetch = 0 : i64, scratch_operands = 0 : i64, tpu.core_type = #tpu.core_type<tc>, window_params = [{transform_indices = @transform_0, window_bounds = array<i64: 1, 8, 256>}, {pipeline_mode = #tpu.pipeline_mode<synchronous>, transform_indices = @transform_1, window_bounds = array<i64: 8, 2>}, {pipeline_mode = #tpu.pipeline_mode<synchronous>, transform_indices = @transform_2, window_bounds = array<i64: 1, 2>}, {pipeline_mode = #tpu.pipeline_mode<synchronous>, transform_indices = @transform_3, window_bounds = array<i64: 2, 8>}, {pipeline_mode = #tpu.pipeline_mode<synchronous>, transform_indices = @transform_4, window_bounds = array<i64: 1, 8>}, {transform_indices = @transform_5, window_bounds = array<i64: 1, 8, 256>}]} {
    %c0 = arith.constant 0 : index
    %c0_0 = arith.constant 0 : index
    %c0_1 = arith.constant 0 : index
    %0 = vector.load %arg1[%c0, %c0_0, %c0_1] : memref<1x8x256xf32, #tpu.memory_space<vmem>>, vector<1x8x256xf32>
    %cst = arith.constant dense<0.000000e+00> : vector<1x8xf32>
    %1 = vector.multi_reduction <add>, %0, %cst [2] : vector<1x8x256xf32> to vector<1x8xf32>
    %cst_2 = arith.constant 3.906250e-03 : f32
    %2 = vector.broadcast %cst_2 : f32 to vector<1x8xf32>
    %3 = arith.mulf %1, %2 : vector<1x8xf32>
    %c0_3 = arith.constant 0 : index
    %c0_4 = arith.constant 0 : index
    %4 = vector.load %arg2[%c0_3, %c0_4] : memref<8x2xf32, #tpu.memory_space<vmem>>, vector<8x2xf32>
    %cst_5 = arith.constant dense<0.000000e+00> : vector<1x2xf32>
    %5 = tpu.matmul %3, %4, %cst_5 {dimension_numbers = #tpu.dot_dimension_numbers<[1], [0], [0], [1], [0, 0, 1, 1], [], []>} : vector<1x8xf32>, vector<8x2xf32>, vector<1x2xf32> -> vector<1x2xf32>
    %c0_6 = arith.constant 0 : index
    %c0_7 = arith.constant 0 : index
    %6 = vector.load %arg3[%c0_6, %c0_7] : memref<1x2xf32, #tpu.memory_space<vmem>>, vector<1x2xf32>
    %7 = arith.addf %5, %6 : vector<1x2xf32>
    %cst_8 = arith.constant 0.000000e+00 : f32
    %8 = vector.broadcast %cst_8 : f32 to vector<1x2xf32>
    %9 = arith.maximumf %7, %8 : vector<1x2xf32>
    %c0_9 = arith.constant 0 : index
    %c0_10 = arith.constant 0 : index
    %10 = vector.load %arg4[%c0_9, %c0_10] : memref<2x8xf32, #tpu.memory_space<vmem>>, vector<2x8xf32>
    %cst_11 = arith.constant dense<0.000000e+00> : vector<1x8xf32>
    %11 = tpu.matmul %9, %10, %cst_11 {dimension_numbers = #tpu.dot_dimension_numbers<[1], [0], [0], [1], [0, 0, 1, 1], [], []>} : vector<1x2xf32>, vector<2x8xf32>, vector<1x8xf32> -> vector<1x8xf32>
    %c0_12 = arith.constant 0 : index
    %c0_13 = arith.constant 0 : index
    %12 = vector.load %arg5[%c0_12, %c0_13] : memref<1x8xf32, #tpu.memory_space<vmem>>, vector<1x8xf32>
    %13 = arith.addf %11, %12 : vector<1x8xf32>
    %14 = arith.negf %13 : vector<1x8xf32>
    %15 = math.exp %14 : vector<1x8xf32>
    %cst_14 = arith.constant 1.000000e+00 : f32
    %16 = vector.broadcast %cst_14 : f32 to vector<1x8xf32>
    %17 = arith.addf %16, %15 : vector<1x8xf32>
    %18 = arith.divf %16, %17 : vector<1x8xf32>
    %c0_15 = arith.constant 0 : index
    %c0_16 = arith.constant 0 : index
    %c0_17 = arith.constant 0 : index
    %19 = vector.load %arg1[%c0_15, %c0_16, %c0_17] : memref<1x8x256xf32, #tpu.memory_space<vmem>>, vector<1x8x256xf32>
    %20 = vector.shape_cast %18 : vector<1x8xf32> to vector<1x8x1xf32>
    %21 = vector.broadcast %20 : vector<1x8x1xf32> to vector<1x8x256xf32>
    %22 = arith.mulf %19, %21 : vector<1x8x256xf32>
    %c0_18 = arith.constant 0 : index
    %c0_19 = arith.constant 0 : index
    %c0_20 = arith.constant 0 : index
    %23 = vector.load %arg6[%c0_18, %c0_19, %c0_20] : memref<1x8x256xf32, #tpu.memory_space<vmem>>, vector<1x8x256xf32>
    tpu.vector_store %arg6[%c0_18, %c0_19, %c0_20], %22 {strides = array<i32>} : memref<1x8x256xf32, #tpu.memory_space<vmem>>, vector<1x8x256xf32>,
    return
  }
  func.func @transform_0(%arg0: i32) -> (i32, i32, i32) {
    %c0_i32 = arith.constant 0 : i32
    %c0_i32_0 = arith.constant 0 : i32
    %c0_i32_1 = arith.constant 0 : i32
    return %arg0, %c0_i32, %c0_i32_0 : i32, i32, i32
  }
  func.func @transform_1(%arg0: i32) -> (i32, i32) {
    %c0_i32 = arith.constant 0 : i32
    %c0_i32_0 = arith.constant 0 : i32
    %c0_i32_1 = arith.constant 0 : i32
    return %c0_i32, %c0_i32_0 : i32, i32
  }
  func.func @transform_2(%arg0: i32) -> (i32, i32) {
    %c0_i32 = arith.constant 0 : i32
    %c0_i32_0 = arith.constant 0 : i32
    %c0_i32_1 = arith.constant 0 : i32
    return %c0_i32, %c0_i32_0 : i32, i32
  }
  func.func @transform_3(%arg0: i32) -> (i32, i32) {
    %c0_i32 = arith.constant 0 : i32
    %c0_i32_0 = arith.constant 0 : i32
    %c0_i32_1 = arith.constant 0 : i32
    return %c0_i32, %c0_i32_0 : i32, i32
  }
  func.func @transform_4(%arg0: i32) -> (i32, i32) {
    %c0_i32 = arith.constant 0 : i32
    %c0_i32_0 = arith.constant 0 : i32
    %c0_i32_1 = arith.constant 0 : i32
    return %c0_i32, %c0_i32_0 : i32, i32
  }
  func.func @transform_5(%arg0: i32) -> (i32, i32, i32) {
    %c0_i32 = arith.constant 0 : i32
    %c0_i32_0 = arith.constant 0 : i32
    %c0_i32_1 = arith.constant 0 : i32
    return %arg0, %c0_i32, %c0_i32_0 : i32, i32, i32
  }
}

</mosaic_0001>

<bundles_post_ra>
// kernel: squeeze_excite.1
= control target key start
LH: loop header
LB: loop body
LE: loop exit
PB: predicated region body
PF: predicated region fallthrough
CT: control target
= control target key end

     0   :  { %s444_s18 = smov 0   ;;  %s480_s0 = inlined_call_operand.vmem [shape: f32[2,8,256], index: 0, kind: input, shape index: {}]   ;;  %s481_s1 = inlined_call_operand.vmem [shape: f32[8,2], index: 1, kind: input, shape index: {}]   ;;  %s482_s2 = inlined_call_operand.vmem [shape: f32[1,2], index: 2, kind: input, shape index: {}]   ;;  %s483_s3 = inlined_call_operand.vmem [shape: f32[2,8], index: 3, kind: input, shape index: {}]   ;;  %s484_s4 = inlined_call_operand.vmem [shape: f32[1,8], index: 4, kind: input, shape index: {}]   ;;  %s485_s5 = inlined_call_operand.vmem [shape: f32[2,8,256], index: 5, kind: output, shape index: {}]  }
   0x1 LB: > { %s376_s19 = sadd.s32 4294967295, %s412_s18   ;;  %p380_p0 = scmp.ge.s32.totalorder %s412_s18, 1  ;;  %s412_s18 = sphi %s444_s18, %s15_s18  }
   0x2   : > { %p187_p1 = scmp.lt.s32.totalorder %s412_s18, 3 }
   0x4   : > { %p188_p2 = pnand %p380_p0, %p187_p1 }
   0x5   : > { %p215_p3 = scmp.lt.s32.totalorder (!%p188_p2), %s376_s19, 1 }
   0x6   : > { %191 = sbr.rel (%p188_p2) target bundleno = 544 (0x220), region = 40 }
   0xb   : > { %s487_s19 = smov (!%p215_p3, %s376_s19), 1  ;;  %v231_v3 = vld [vmem:[%s481_s1] sm:$0xff]  ;;  %v234_v4 = vlaneseq  ;;  %vm237_vm0 = vcmask 64512   ;;  %vm267_vm1 = vcmask 1041408   ;;  %vm263_vm2 = vcmask 15360  }
   0xc   : > { %s391_s20 = sshll.u32 %s487_s19, 4  ;;  %255 = vmatpush.msra.mxu0 %v231_v3  ;;  %v261_v9 = vld [vmem:[%s483_s3] sm:$0x3] }
   0xd   : > { %s219_s23 = scalar_lea.vmem %s480_s0, %s391_s20  ;;  %v235_v5 = vand.u32 127, %v234_v4  ;;  %386 = vmatpush.msk.msra.mxu1 %vm267_vm1, %v261_v9  ;;  %v232_v10 = vld [vmem:[%s482_s2] sm:$0x1]  ;;  %v312_v14 = vshrl.u32 %v234_v4, 7  ;;  %s224_s9 = scalar_lea.vmem %s485_s5, %s391_s20 }
   0xe   : > { %v225_v0 = vld [vmem:[%s219_s23] sm:$0xff]  ;;  %v226_v1 = vld [vmem:[%s219_s23 + $0x8] sm:$0xff] }
   0xf   : > { %v227_v2 = vadd.f32 %v226_v1, %v225_v0  ;;  %401 = vset.pattern.permute.xlu0 %v312_v14  ;;  %v262_v15 = vld [vmem:[%s484_s4] sm:$0x1] }
  0x11   : > { %228 = vadd.xlane.f32.xlu0 %v227_v2 }
  0x84   : > { %v229_v6 = vpop.xlane.xlu0 %228 }
  0x85   : > { %v230_v7 = vmul.f32 0.00390625, %v229_v6 }
  0x87   : > { %v236_v8 = vperm.slane %v230_v7, %v235_v5 }
  0x89   : > { %385 = vmatmul.msk.f32.vlgmr.msra.gmra.mxu0 %vm237_vm0, %v236_v8 }
 0x106   : > { %v257_v11 = vpop.f32.mrf.mxu0 }
 0x107   : > { %v258_v12 = vadd.f32 %v257_v11, %v232_v10 }
 0x109   : > { %v260_v13 = vmax.f32 %v258_v12, 0.0 }
 0x10b   : > { %387 = vmatmul.msk.f32.vlgmr.msra.gmra.mxu1 %vm263_vm2, %v260_v13 }
 0x188   : > { %v288_v16 = vpop.f32.mrf.mxu1 }
 0x189   : > { %v289_v17 = vadd.f32 %v288_v16, %v262_v15 }
 0x18b   : > { %v388_v18 = vmul.f32 -1.442695, %v289_v17 }
 0x18d   : > { %402 = vpow2.f32 %v388_v18 }
 0x193   : > { %v403_v19 = vpop.eup %402 }
 0x194   : > { %v294_v20 = vadd.f32 1.0, %v403_v19 }
 0x196   : > { %404 = vrcp.f32 %v294_v20  ;;  %v306_v24 = vand.u32 2147483648, %v294_v20  ;;  %v304_v26 = vand.u32 2147483647, %v294_v20  ;;  %vm300_vm4 = vweird.f32 %v294_v20 }
 0x198   : > { %v307_v28 = vor.u32 1.1754944e-38, %v306_v24  ;;  %vm305_vm6 = vcmp.eq.f32.partialorder %v304_v26, 8.507059e+37 }
 0x19c   : > { %v405_v21 = vpop.eup %404 }
 0x19d   : > { %v296_v22 = vmul.f32 %v405_v21, %v294_v20  ;;  %vm301_vm3 = vweird.f32 %v405_v21 }
 0x19e   : > { %vm302_vm5 = vmor %vm300_vm4, %vm301_vm3 }
 0x19f   : > { %v297_v23 = vsub.f32 1.0, %v296_v22 }
 0x1a1   : > { %v298_v25 = vmul.f32 %v405_v21, %v297_v23 }
 0x1a3   : > { %v299_v27 = vadd.f32 %v405_v21, %v298_v25 }
 0x1a5   : > { %v303_v29 = vsel %vm302_vm5, %v405_v21, %v299_v27 }
 0x1a6   : > { %v308_v30 = vsel %vm305_vm6, %v307_v28, %v303_v29 }
 0x1a7   : > { %v310_v31 = vperm.slane %v308_v30, 0 }
 0x1a9   : > { %315 = vperm.xlu0 %401, %v310_v31  }
 0x21b   : > { %v316_v32 = vpop.permute.xlu0 %315 }
 0x21c   : > { %v317_v33 = vmul.f32 %v316_v32, %v225_v0  ;;  %v318_v34 = vmul.f32 %v316_v32, %v226_v1 }
 0x21e   : > { %319 = vst [vmem:[%s224_s9] sm:$0xff] %v317_v33 }
 0x21f   : > { %320 = vst [vmem:[%s224_s9 + $0x8] sm:$0xff] %v318_v34 }
 0x220 PF: > { %s15_s18 = sadd.s32 1, %s412_s18  }
 0x221   : > { %p12_p4 = scmp.ge.s32.totalorder %s15_s18, 4  }
 0x223   :  { %14 = sbr.rel (!%p12_p4) target bundleno = 1 (0x1), region = 70 }

</bundles_post_ra>
